<compile_context>
chip_gen: v7x
topology: tpu7x:2x2x1
jax: 0.10.0
libtpu: 0.0.40
codegen_flags: <defaults>
</compile_context>

<pallas_src>
import jax
import jax.numpy as jnp
from jax.experimental import pallas as pl
from jax.experimental.pallas import tpu as pltpu


def _gaussian_kernel(params_ref, x_ref, o_ref):
    # params_ref: (2,) f32 in SMEM -> [C, -0.5 / Sigma^2]
    # x_ref / o_ref: (tile_r, lane_w) tiles in VMEM, native dtype
    c = params_ref[0]
    scale = params_ref[1]
    x = x_ref[...].astype(jnp.float32)
    o_ref[...] = (c * jnp.exp(scale * (x * x))).astype(o_ref.dtype)


def _run_tiled(x2d, params):
    rows, lane_w = x2d.shape
    dtype = x2d.dtype
    itemsize = jnp.dtype(dtype).itemsize

    # ~2 MiB per input tile buffer; rows rounded down to a sublane multiple.
    target_rows = max(8, (2 << 20) // (lane_w * itemsize))
    if rows <= target_rows:
        tile_r = rows                      # single block == full first dim
    else:
        tile_r = max(8, (target_rows // 8) * 8)

    grid = (pl.cdiv(rows, tile_r),)

    return pl.pallas_call(
        _gaussian_kernel,
        out_shape=jax.ShapeDtypeStruct((rows, lane_w), dtype),
        grid_spec=pltpu.PrefetchScalarGridSpec(
            num_scalar_prefetch=1,
            grid=grid,
            in_specs=[
                pl.BlockSpec((tile_r, lane_w), lambda i, params: (i, 0)),
            ],
            out_specs=pl.BlockSpec((tile_r, lane_w), lambda i, params: (i, 0)),
        ),
        compiler_params=pltpu.CompilerParams(
            dimension_semantics=("parallel",),
        ),
    )(params, x2d)


def gaussian_forward(x, C, Sigma):
    """y = C * exp(-x**2 / (2 * Sigma**2)), elementwise, any shape/dtype."""
    orig_shape = x.shape
    n = x.size

    c_val = jnp.asarray(C, dtype=jnp.float32)
    s_val = jnp.asarray(Sigma, dtype=jnp.float32)
    params = jnp.stack([c_val, -0.5 / (s_val * s_val)])

    # Prefer a free reshape into a wide, lane-dense slab (no pad / no copy).
    lane_w = None
    for w in (4096, 2048, 1024, 512, 256, 128):
        if n % w == 0:
            lane_w = w
            break

    if lane_w is not None:
        out2d = _run_tiled(x.reshape(-1, lane_w), params)
        return out2d.reshape(orig_shape)

    # Ragged total size: single pad + slice (rare path).
    lane_w = 128
    pad = (-n) % lane_w
    x2d = jnp.pad(x.reshape(-1), (0, pad)).reshape(-1, lane_w)
    out2d = _run_tiled(x2d, params)
    return out2d.reshape(-1)[:n].reshape(orig_shape)


if __name__ == "__main__":
    key = jax.random.PRNGKey(0)
    C_param = 1.5
    Sigma_param = 0.7
    inv2s2 = -0.5 / (Sigma_param ** 2)

    # 1) f32 NCHW-style input (free-reshape path)
    x = jax.random.normal(key, (2, 4, 16, 16), dtype=jnp.float32)
    y = jax.block_until_ready(gaussian_forward(x, C_param, Sigma_param))
    y_ref = C_param * jnp.exp(inv2s2 * jnp.square(x))
    assert y.shape == x.shape and y.dtype == x.dtype
    assert jnp.allclose(y, y_ref, atol=1e-5, rtol=1e-5), "f32 mismatch"

    # 2) bf16 input (native dtype kept at the HBM boundary)
    xb = x.astype(jnp.bfloat16)
    yb = jax.block_until_ready(gaussian_forward(xb, C_param, Sigma_param))
    yb_ref = (C_param * jnp.exp(inv2s2 * jnp.square(xb.astype(jnp.float32)))
              ).astype(jnp.bfloat16)
    assert yb.dtype == jnp.bfloat16
    assert jnp.allclose(yb.astype(jnp.float32), yb_ref.astype(jnp.float32),
                        atol=2e-2, rtol=2e-2), "bf16 mismatch"

    # 3) ragged total size (pad fallback path)
    xr = jax.random.normal(jax.random.PRNGKey(1), (3, 5, 7), dtype=jnp.float32)
    yr = jax.block_until_ready(gaussian_forward(xr, C_param, Sigma_param))
    yr_ref = C_param * jnp.exp(inv2s2 * jnp.square(xr))
    assert yr.shape == xr.shape
    assert jnp.allclose(yr, yr_ref, atol=1e-5, rtol=1e-5), "ragged mismatch"

    print("KERNEL_OK")
</pallas_src>

<mosaic_0001>
module attributes {stable_mosaic.version = 11 : i64} {
  func.func @_gaussian_kernel(%arg0: i32, %arg1: memref<2xf32, #tpu.memory_space<smem>>, %arg2: memref<1x2048xf32, #tpu.memory_space<vmem>>, %arg3: memref<1x2048xf32, #tpu.memory_space<vmem>>) attributes {dimension_semantics = [#tpu.dimension_semantics<parallel>], iteration_bounds = array<i64: 1>, scalar_prefetch = 1 : i64, scratch_operands = 0 : i64, tpu.core_type = #tpu.core_type<tc>, window_params = [{transform_indices = @transform_0, window_bounds = array<i64: 1, 2048>}, {transform_indices = @transform_1, window_bounds = array<i64: 1, 2048>}]} {
    %c0 = arith.constant 0 : index
    %0 = memref.load %arg1[%c0] : memref<2xf32, #tpu.memory_space<smem>>
    %c1 = arith.constant 1 : index
    %1 = memref.load %arg1[%c1] : memref<2xf32, #tpu.memory_space<smem>>
    %c0_0 = arith.constant 0 : index
    %c0_1 = arith.constant 0 : index
    %2 = vector.load %arg2[%c0_0, %c0_1] : memref<1x2048xf32, #tpu.memory_space<vmem>>, vector<1x2048xf32>
    %3 = arith.mulf %2, %2 : vector<1x2048xf32>
    %4 = vector.broadcast %1 : f32 to vector<1x2048xf32>
    %5 = arith.mulf %4, %3 : vector<1x2048xf32>
    %6 = math.exp %5 : vector<1x2048xf32>
    %7 = vector.broadcast %0 : f32 to vector<1x2048xf32>
    %8 = arith.mulf %7, %6 : vector<1x2048xf32>
    %c0_2 = arith.constant 0 : index
    %c0_3 = arith.constant 0 : index
    %9 = vector.load %arg3[%c0_2, %c0_3] : memref<1x2048xf32, #tpu.memory_space<vmem>>, vector<1x2048xf32>
    tpu.vector_store %arg3[%c0_2, %c0_3], %8 {strides = array<i32>} : memref<1x2048xf32, #tpu.memory_space<vmem>>, vector<1x2048xf32>,
    return
  }
  func.func @transform_0(%arg0: i32, %arg1: memref<2xf32, #tpu.memory_space<smem>>) -> (i32, i32) {
    %c0_i32 = arith.constant 0 : i32
    %c0_i32_0 = arith.constant 0 : i32
    return %arg0, %c0_i32 : i32, i32
  }
  func.func @transform_1(%arg0: i32, %arg1: memref<2xf32, #tpu.memory_space<smem>>) -> (i32, i32) {
    %c0_i32 = arith.constant 0 : i32
    %c0_i32_0 = arith.constant 0 : i32
    return %arg0, %c0_i32 : i32, i32
  }
}

</mosaic_0001>

<bundles_post_ra>
// kernel: tpu_custom_call.1
= control target key start
LH: loop header
LB: loop body
LE: loop exit
PB: predicated region body
PF: predicated region fallthrough
CT: control target
= control target key end

     0   :  { %s181_s0 = inlined_call_operand.hbm [shape: f32[2], index: 0, kind: input, shape index: {}]   ;;  %s182_s1 = inlined_call_operand.hbm [shape: f32[1,2048], index: 1, kind: input, shape index: {}]   ;;  %s183_s2 = inlined_call_operand.hbm [shape: f32[1,2048], index: 2, kind: output, shape index: {}]  }
   0x1   :  { %s67_s11 = scalar_lea.hbm %s181_s0, 16 }
   0x2   :  { %p68_p0 = scmp.ne.s32.totalorder %s181_s0, %s67_s11  ;;  %p71_p1 = scmp.lt.u32.totalorder %s67_s11, %s181_s0 }
   0x4   :  { %p73_p2 = pnand %p71_p1, %p68_p0 }
   0x6   :  { %76 = shalt.err (!%p73_p2)  }
   0x7   :  { %s127_s16 = smov [#allocation3]  }
   0x8   :  { %8 = dma.hbm_to_smem %s181_s0, 16, %s127_s16, [#allocation2] }
   0x9   :  { %121 = dma.done.wait [#allocation2], 16 }
   0xa   :  { %122 = vsyncadd [#allocation2], 4294967280 }
   0xb   :  { %10 = sfence }
   0xc   :  { %11 = vsyncpa [#allocation5], 0 }
   0xd   :  { %12 = vsyncpa [#allocation6], 0  ;;  %s128_s19 = smov [#allocation4]   ;;  %s77_s23 = scalar_lea.hbm %s182_s1, 256 }
   0xe   :  { %s19_s20 = sshll.u32 %s128_s19, 4  ;;  %p78_p3 = scmp.ne.s32.totalorder %s182_s1, %s77_s23  ;;  %s20_s20 = int_to_ptr.vmem [resolvable:$true] %s19_s20 }
   0xf   :  { %p81_p4 = scmp.lt.u32.totalorder %s77_s23, %s182_s1 }
  0x11   :  { %p83_p5 = pnand %p81_p4, %p78_p3 }
  0x13   :  { %86 = shalt.err (!%p83_p5)
}
  0x14   :  { %s87_s0 = scalar_lea.vmem %s20_s20, 256  ;;  %p92_p7 = scmp.lt.s32.totalorder %s20_s20, %s20_s20 }
  0x15   :  { %p88_p6 = scmp.ne.s32.totalorder %s20_s20, %s87_s0  ;;  %p93_p8 = scmp.lt.s32.totalorder %s87_s0, %s87_s0 }
  0x17   :  { %p94_p9 = por %p93_p8, %p92_p7 }
  0x19   :  { %p95_p10 = pnand %p94_p9, %p88_p6 }
  0x1b   :  { %98 = shalt.err (!%p95_p10)
}
  0x1c   :  { %22 = dma.hbm_to_vmem [thread:$0]  %s182_s1, 256, %s20_s20, [#allocation5]  }
  0x1d   :  { %123 = dma.done.wait [#allocation5], 256  }
  0x1e   :  { %124 = vsyncadd [#allocation5], 4294967040  ;;  %s59_s30 = sld [smem:[#allocation3 + $0x1]]  ;;  %v28_v1 = vld [vmem:[#allocation4] sm:$0xff]  ;;  %v29_v2 = vld [vmem:[#allocation4 + $0x8] sm:$0xff]  ;;  %s26_s3 = sld [smem:[#allocation3]] }
  0x1f   :  { %v30_v3 = vmul.f32 %v28_v1, %v28_v1  ;;  %v31_v4 = vmul.f32 %v29_v2, %v29_v2  ;;  %s129_s4 = smov [#allocation7]  }
  0x20   :  { %s50_s5 = sshll.u32 %s129_s4, 4  ;;  %s51_s5 = int_to_ptr.vmem [resolvable:$true] %s50_s5 }
  0x21   :  { %s99_s1 = scalar_lea.vmem %s51_s5, 256  ;;  %p104_p12 = scmp.lt.s32.totalorder %s51_s5, %s51_s5 }
  0x22   :  { %p100_p11 = scmp.ne.s32.totalorder %s51_s5, %s99_s1  ;;  %p105_p13 = scmp.lt.s32.totalorder %s99_s1, %s99_s1 }
  0x24   :  { %v32_v0 = vstv %s59_s30  ;;  %v39_v9 = vstv %s26_s3  ;;  %p106_p0 = por %p105_p13, %p104_p12 }
  0x25   :  { %v33_v5 = vmul.f32 %v32_v0, %v30_v3  ;;  %v34_v6 = vmul.f32 %v32_v0, %v31_v4 }
  0x26   :  { %p107_p1 = pnand %p106_p0, %p100_p11 }
  0x27   :  { %v35_v7 = vmul.f32 1.442695, %v33_v5  ;;  %v37_v8 = vmul.f32 1.442695, %v34_v6 }
  0x29   :  { %63 = vpow2.f32 %v35_v7 }
  0x2a   :  { %65 = vpow2.f32 %v37_v8 }
  0x33   :  { %v64_v10 = vpop.eup %63 }
  0x34   :  { %v66_v11 = vpop.eup %65  ;;  %v40_v12 = vmul.f32 %v64_v10, %v39_v9 }
  0x35   :  { %v41_v13 = vmul.f32 %v66_v11, %v39_v9 }
  0x36   :  { %42 = vst [vmem:[#allocation7] sm:$0xff] %v40_v12 }
  0x37   :  { %43 = vst [vmem:[#allocation7 + $0x8] sm:$0xff] %v41_v13 }
  0x38   :  { %110 = shalt.err (!%p107_p1)
}
  0x39   :  { %s111_s8 = scalar_lea.hbm %s183_s2, 256 }
  0x3a   :  { %p112_p2 = scmp.ne.s32.totalorder %s183_s2, %s111_s8  ;;  %p115_p3 = scmp.lt.u32.totalorder %s111_s8, %s183_s2 }
  0x3c   :  { %p117_p4 = pnand %p115_p3, %p112_p2 }
  0x3e   :  { %120 = shalt.err (!%p117_p4)
}
  0x3f   :  { %53 = dma.vmem_to_hbm [thread:$0]  %s51_s5, 256, %s183_s2, [#allocation6]  }
  0x40   :  { %125 = dma.done.wait [#allocation6], 256  }
  0x41   :  { %126 = vsyncadd [#allocation6], 4294967040 }
  0x42   :  { %57 = vsyncpa [#allocation5], 1 }
  0x43   :  { %58 = vsyncpa [#allocation6], 1 }

</bundles_post_ra>
